<compile_context>
chip_gen: v6e
topology: v6e:2x2x1
jax: 0.10.0
libtpu: 0.0.40
codegen_flags: <defaults>
</compile_context>

<pallas_src>
import functools

import jax
import jax.numpy as jnp
from jax.experimental import pallas as pl
from jax.experimental.pallas import tpu as pltpu

NUM_INPUT = 784
NUM_HIDDEN_1 = 128
NUM_HIDDEN_2 = 64
NUM_OUTPUT = 10


def _mlp_kernel(x_ref, w1_ref, b1_ref, w2_ref, b2_ref, w3_ref, b3_ref, o_ref):
    # Cast the f32 input block to bf16 in-kernel (VPU convert; avoids a wrapper-side
    # cast that would cost an extra full HBM pass over x).
    x = x_ref[...].astype(w1_ref.dtype)

    # Layer 1: Linear(784 -> 128) + ReLU  (bf16 x bf16 -> f32 accumulation on the MXU).
    h1 = jnp.dot(x, w1_ref[...], preferred_element_type=jnp.float32)
    h1 = jnp.maximum(h1 + b1_ref[...], 0.0).astype(w2_ref.dtype)

    # Layer 2: Linear(128 -> 64) + ReLU.
    h2 = jnp.dot(h1, w2_ref[...], preferred_element_type=jnp.float32)
    h2 = jnp.maximum(h2 + b2_ref[...], 0.0).astype(w3_ref.dtype)

    # Layer 3: Linear(64 -> 10) + softmax over the feature axis (f32 throughout).
    logits = jnp.dot(h2, w3_ref[...], preferred_element_type=jnp.float32) + b3_ref[...]
    m = jnp.max(logits, axis=-1, keepdims=True)
    e = jnp.exp(logits - m)
    denom = jnp.sum(e, axis=-1, keepdims=True)
    # Exact division: rows sum to 1 within f32 rounding (approx reciprocal does not).
    o_ref[...] = (e / denom).astype(o_ref.dtype)


def _round_up(v, m):
    return -(-v // m) * m


def _choose_batch_tile(batch, requested, align=8, min_steps=4):
    """Alignment-respecting batch tile, clamped to the batch.

    Prefers >= min_steps grid steps (2 per v7x TensorCore) when the batch permits, so
    each core keeps its input DMA double-buffered; single-core chips are unaffected.
    """
    tile = max(align, (requested // align) * align)
    tile = min(tile, _round_up(batch, align))
    while -(-batch // tile) < min_steps and tile >= 2 * align:
        tile = _round_up(tile // 2, align)
    return tile


@functools.partial(jax.jit, static_argnames=("batch_tile", "compute_dtype"))
def new_nn_forward(x, params, *, batch_tile=1024, compute_dtype=jnp.bfloat16):
    """x: (B, 784) float32. Returns softmax probabilities (B, 10) in float32."""
    B = x.shape[0]
    x = x.astype(jnp.float32)          # kernel casts the block to bf16 internally
    tile = _choose_batch_tile(B, batch_tile)
    grid = (pl.cdiv(B, tile),)         # ragged last block: OOB rows read garbage,
                                       # their output rows are never written back.

    # Weights are tiny (~0.2 MiB bf16); cast once in the wrapper. Biases stay f32.
    w1 = params["w1"].astype(compute_dtype)
    w2 = params["w2"].astype(compute_dtype)
    w3 = params["w3"].astype(compute_dtype)
    b1 = params["b1"].astype(jnp.float32)
    b2 = params["b2"].astype(jnp.float32)
    b3 = params["b3"].astype(jnp.float32)

    def weight_spec(shape):
        # Constant index_map -> block stays VMEM-resident, no re-DMA across grid steps.
        return pl.BlockSpec(shape, lambda i: (0, 0))

    weight_elems = (NUM_INPUT * NUM_HIDDEN_1 + NUM_HIDDEN_1 * NUM_HIDDEN_2
                    + NUM_HIDDEN_2 * NUM_OUTPUT)
    cost = pl.CostEstimate(
        flops=2 * B * weight_elems,
        transcendentals=B * NUM_OUTPUT,
        bytes_accessed=(B * NUM_INPUT * 4                                   # x (f32)
                        + weight_elems * 2                                  # weights (bf16)
                        + (NUM_HIDDEN_1 + NUM_HIDDEN_2 + NUM_OUTPUT) * 4    # biases
                        + B * NUM_OUTPUT * 4),                              # output (f32)
    )

    out = pl.pallas_call(
        _mlp_kernel,
        out_shape=jax.ShapeDtypeStruct((B, NUM_OUTPUT), jnp.float32),
        grid_spec=pltpu.PrefetchScalarGridSpec(
            num_scalar_prefetch=0,
            grid=grid,
            in_specs=[
                pl.BlockSpec((tile, NUM_INPUT), lambda i: (i, 0)),
                weight_spec((NUM_INPUT, NUM_HIDDEN_1)),
                weight_spec((1, NUM_HIDDEN_1)),
                weight_spec((NUM_HIDDEN_1, NUM_HIDDEN_2)),
                weight_spec((1, NUM_HIDDEN_2)),
                weight_spec((NUM_HIDDEN_2, NUM_OUTPUT)),
                weight_spec((1, NUM_OUTPUT)),
            ],
            out_specs=pl.BlockSpec((tile, NUM_OUTPUT), lambda i: (i, 0)),
        ),
        compiler_params=pltpu.CompilerParams(
            dimension_semantics=("parallel",),
            vmem_limit_bytes=32 * 1024 * 1024,
        ),
        cost_estimate=cost,
    )(x, w1, b1, w2, b2, w3, b3)

    return out


def init_params(key):
    """Deterministic parameter init. Weights stored (in, out) = PyTorch weight.T."""
    k1, k2, k3, k4, k5, k6 = jax.random.split(key, 6)

    def lin(kw, kb, fan_in, fan_out):
        bound = 1.0 / jnp.sqrt(fan_in)
        w = jax.random.uniform(kw, (fan_in, fan_out), jnp.float32, -bound, bound)
        b = jax.random.uniform(kb, (1, fan_out), jnp.float32, -bound, bound)
        return w, b

    w1, b1 = lin(k1, k2, NUM_INPUT, NUM_HIDDEN_1)
    w2, b2 = lin(k3, k4, NUM_HIDDEN_1, NUM_HIDDEN_2)
    w3, b3 = lin(k5, k6, NUM_HIDDEN_2, NUM_OUTPUT)
    return {"w1": w1, "b1": b1, "w2": w2, "b2": b2, "w3": w3, "b3": b3}


def reference_forward(x, p):
    h1 = jnp.maximum(x @ p["w1"] + p["b1"], 0.0)
    h2 = jnp.maximum(h1 @ p["w2"] + p["b2"], 0.0)
    logits = h2 @ p["w3"] + p["b3"]
    return jax.nn.softmax(logits, axis=1)


if __name__ == "__main__":
    key = jax.random.PRNGKey(0)
    kx, kp = jax.random.split(key)

    # Small batch, deliberately not a multiple of 8: exercises the ragged-last-block path
    # and produces a multi-step "parallel" grid.
    B = 37
    x = jax.random.normal(kx, (B, NUM_INPUT), dtype=jnp.float32)
    params = init_params(kp)

    out = jax.block_until_ready(new_nn_forward(x, params))
    ref = reference_forward(x, params)

    assert out.shape == (B, NUM_OUTPUT)
    # bf16 inputs/weights (f32 accumulation) -> loose elementwise tolerance vs f32 reference.
    assert jnp.allclose(out, ref, atol=5e-3, rtol=0.0), "mismatch vs JAX reference"
    # Exact division in the kernel -> rows sum to 1 within f32 rounding.
    assert jnp.allclose(jnp.sum(out, axis=1), 1.0, atol=2e-3), "softmax rows must sum to 1"

    print("KERNEL_OK")
</pallas_src>

<mosaic_0001>
module attributes {stable_mosaic.version = 11 : i64} {
  func.func @_mlp_kernel(%arg0: i32, %arg1: memref<8x784xf32, #tpu.memory_space<vmem>>, %arg2: memref<784x128xbf16, #tpu.memory_space<vmem>>, %arg3: memref<1x128xf32, #tpu.memory_space<vmem>>, %arg4: memref<128x64xbf16, #tpu.memory_space<vmem>>, %arg5: memref<1x64xf32, #tpu.memory_space<vmem>>, %arg6: memref<64x10xbf16, #tpu.memory_space<vmem>>, %arg7: memref<1x10xf32, #tpu.memory_space<vmem>>, %arg8: memref<8x10xf32, #tpu.memory_space<vmem>>) attributes {dimension_semantics = [#tpu.dimension_semantics<parallel>], iteration_bounds = array<i64: 5>, scalar_prefetch = 0 : i64, scratch_operands = 0 : i64, tpu.core_type = #tpu.core_type<tc>, window_params = [{transform_indices = @transform_0, window_bounds = array<i64: 8, 784>}, {pipeline_mode = #tpu.pipeline_mode<synchronous>, transform_indices = @transform_1, window_bounds = array<i64: 784, 128>}, {pipeline_mode = #tpu.pipeline_mode<synchronous>, transform_indices = @transform_2, window_bounds = array<i64: 1, 128>}, {pipeline_mode = #tpu.pipeline_mode<synchronous>, transform_indices = @transform_3, window_bounds = array<i64: 128, 64>}, {pipeline_mode = #tpu.pipeline_mode<synchronous>, transform_indices = @transform_4, window_bounds = array<i64: 1, 64>}, {pipeline_mode = #tpu.pipeline_mode<synchronous>, transform_indices = @transform_5, window_bounds = array<i64: 64, 10>}, {pipeline_mode = #tpu.pipeline_mode<synchronous>, transform_indices = @transform_6, window_bounds = array<i64: 1, 10>}, {transform_indices = @transform_7, window_bounds = array<i64: 8, 10>}]} {
    %c0 = arith.constant 0 : index
    %c0_0 = arith.constant 0 : index
    %0 = vector.load %arg1[%c0, %c0_0] : memref<8x784xf32, #tpu.memory_space<vmem>>, vector<8x784xf32>
    %1 = arith.truncf %0 : vector<8x784xf32> to vector<8x784xbf16>
    %c0_1 = arith.constant 0 : index
    %c0_2 = arith.constant 0 : index
    %2 = vector.load %arg2[%c0_1, %c0_2] : memref<784x128xbf16, #tpu.memory_space<vmem>>, vector<784x128xbf16>
    %cst = arith.constant dense<0.000000e+00> : vector<8x128xf32>
    %3 = tpu.matmul %1, %2, %cst {dimension_numbers = #tpu.dot_dimension_numbers<[1], [0], [0], [1], [0, 0, 1, 1], [], []>} : vector<8x784xbf16>, vector<784x128xbf16>, vector<8x128xf32> -> vector<8x128xf32>
    %c0_3 = arith.constant 0 : index
    %c0_4 = arith.constant 0 : index
    %4 = vector.load %arg3[%c0_3, %c0_4] : memref<1x128xf32, #tpu.memory_space<vmem>>, vector<1x128xf32>
    %5 = vector.broadcast %4 : vector<1x128xf32> to vector<8x128xf32>
    %6 = arith.addf %3, %5 : vector<8x128xf32>
    %cst_5 = arith.constant 0.000000e+00 : f32
    %7 = vector.broadcast %cst_5 : f32 to vector<8x128xf32>
    %8 = arith.maximumf %6, %7 : vector<8x128xf32>
    %9 = arith.truncf %8 : vector<8x128xf32> to vector<8x128xbf16>
    %c0_6 = arith.constant 0 : index
    %c0_7 = arith.constant 0 : index
    %10 = vector.load %arg4[%c0_6, %c0_7] : memref<128x64xbf16, #tpu.memory_space<vmem>>, vector<128x64xbf16>
    %cst_8 = arith.constant dense<0.000000e+00> : vector<8x64xf32>
    %11 = tpu.matmul %9, %10, %cst_8 {dimension_numbers = #tpu.dot_dimension_numbers<[1], [0], [0], [1], [0, 0, 1, 1], [], []>} : vector<8x128xbf16>, vector<128x64xbf16>, vector<8x64xf32> -> vector<8x64xf32>
    %c0_9 = arith.constant 0 : index
    %c0_10 = arith.constant 0 : index
    %12 = vector.load %arg5[%c0_9, %c0_10] : memref<1x64xf32, #tpu.memory_space<vmem>>, vector<1x64xf32>
    %13 = vector.broadcast %12 : vector<1x64xf32> to vector<8x64xf32>
    %14 = arith.addf %11, %13 : vector<8x64xf32>
    %cst_11 = arith.constant 0.000000e+00 : f32
    %15 = vector.broadcast %cst_11 : f32 to vector<8x64xf32>
    %16 = arith.maximumf %14, %15 : vector<8x64xf32>
    %17 = arith.truncf %16 : vector<8x64xf32> to vector<8x64xbf16>
    %c0_12 = arith.constant 0 : index
    %c0_13 = arith.constant 0 : index
    %18 = vector.load %arg6[%c0_12, %c0_13] : memref<64x10xbf16, #tpu.memory_space<vmem>>, vector<64x10xbf16>
    %cst_14 = arith.constant dense<0.000000e+00> : vector<8x10xf32>
    %19 = tpu.matmul %17, %18, %cst_14 {dimension_numbers = #tpu.dot_dimension_numbers<[1], [0], [0], [1], [0, 0, 1, 1], [], []>} : vector<8x64xbf16>, vector<64x10xbf16>, vector<8x10xf32> -> vector<8x10xf32>
    %c0_15 = arith.constant 0 : index
    %c0_16 = arith.constant 0 : index
    %20 = vector.load %arg7[%c0_15, %c0_16] : memref<1x10xf32, #tpu.memory_space<vmem>>, vector<1x10xf32>
    %21 = vector.broadcast %20 : vector<1x10xf32> to vector<8x10xf32>
    %22 = arith.addf %19, %21 : vector<8x10xf32>
    %cst_17 = arith.constant dense<0xFF800000> : vector<8xf32>
    %23 = vector.multi_reduction <maximumf>, %22, %cst_17 [1] : vector<8x10xf32> to vector<8xf32>
    %24 = vector.shape_cast %23 : vector<8xf32> to vector<8x1xf32>
    %25 = vector.broadcast %24 : vector<8x1xf32> to vector<8x10xf32>
    %26 = arith.subf %22, %25 : vector<8x10xf32>
    %27 = math.exp %26 : vector<8x10xf32>
    %cst_18 = arith.constant dense<0.000000e+00> : vector<8xf32>
    %28 = vector.multi_reduction <add>, %27, %cst_18 [1] : vector<8x10xf32> to vector<8xf32>
    %29 = vector.shape_cast %28 : vector<8xf32> to vector<8x1xf32>
    %30 = vector.broadcast %29 : vector<8x1xf32> to vector<8x10xf32>
    %31 = arith.divf %27, %30 : vector<8x10xf32>
    %c0_19 = arith.constant 0 : index
    %c0_20 = arith.constant 0 : index
    %32 = vector.load %arg8[%c0_19, %c0_20] : memref<8x10xf32, #tpu.memory_space<vmem>>, vector<8x10xf32>
    tpu.vector_store %arg8[%c0_19, %c0_20], %31 {strides = array<i32>} : memref<8x10xf32, #tpu.memory_space<vmem>>, vector<8x10xf32>,
    return
  }
  func.func @transform_0(%arg0: i32) -> (i32, i32) {
    %c0_i32 = arith.constant 0 : i32
    %c0_i32_0 = arith.constant 0 : i32
    return %arg0, %c0_i32 : i32, i32
  }
  func.func @transform_1(%arg0: i32) -> (i32, i32) {
    %c0_i32 = arith.constant 0 : i32
    %c0_i32_0 = arith.constant 0 : i32
    %c0_i32_1 = arith.constant 0 : i32
    return %c0_i32, %c0_i32_0 : i32, i32
  }
  func.func @transform_2(%arg0: i32) -> (i32, i32) {
    %c0_i32 = arith.constant 0 : i32
    %c0_i32_0 = arith.constant 0 : i32
    %c0_i32_1 = arith.constant 0 : i32
    return %c0_i32, %c0_i32_0 : i32, i32
  }
  func.func @transform_3(%arg0: i32) -> (i32, i32) {
    %c0_i32 = arith.constant 0 : i32
    %c0_i32_0 = arith.constant 0 : i32
    %c0_i32_1 = arith.constant 0 : i32
    return %c0_i32, %c0_i32_0 : i32, i32
  }
  func.func @transform_4(%arg0: i32) -> (i32, i32) {
    %c0_i32 = arith.constant 0 : i32
    %c0_i32_0 = arith.constant 0 : i32
    %c0_i32_1 = arith.constant 0 : i32
    return %c0_i32, %c0_i32_0 : i32, i32
  }
  func.func @transform_5(%arg0: i32) -> (i32, i32) {
    %c0_i32 = arith.constant 0 : i32
    %c0_i32_0 = arith.constant 0 : i32
    %c0_i32_1 = arith.constant 0 : i32
    return %c0_i32, %c0_i32_0 : i32, i32
  }
  func.func @transform_6(%arg0: i32) -> (i32, i32) {
    %c0_i32 = arith.constant 0 : i32
    %c0_i32_0 = arith.constant 0 : i32
    %c0_i32_1 = arith.constant 0 : i32
    return %c0_i32, %c0_i32_0 : i32, i32
  }
  func.func @transform_7(%arg0: i32) -> (i32, i32) {
    %c0_i32 = arith.constant 0 : i32
    %c0_i32_0 = arith.constant 0 : i32
    return %arg0, %c0_i32 : i32, i32
  }
}

</mosaic_0001>

<bundles_post_ra>
// kernel: new_nn_forward.1
= control target key start
LH: loop header
LB: loop body
LE: loop exit
PB: predicated region body
PF: predicated region fallthrough
CT: control target
= control target key end

     0   :  { %s1440_s24 = smov 0   ;;  %s1688_s0 = inlined_call_operand.vmem [shape: f32[37,784], index: 0, kind: input, shape index: {}]   ;;  %s1689_s1 = inlined_call_operand.vmem [shape: bf16[784,128], index: 1, kind: input, shape index: {}]   ;;  %s1690_s2 = inlined_call_operand.vmem [shape: f32[1,128], index: 2, kind: input, shape index: {}]   ;;  %s1691_s3 = inlined_call_operand.vmem [shape: bf16[128,64], index: 3, kind: input, shape index: {}]   ;;  %s1692_s4 = inlined_call_operand.vmem [shape: f32[1,64], index: 4, kind: input, shape index: {}]   ;;  %s1693_s5 = inlined_call_operand.vmem [shape: bf16[64,10], index: 5, kind: input, shape index: {}]   ;;  %s1694_s6 = inlined_call_operand.vmem [shape: f32[1,10], index: 6, kind: input, shape index: {}]   ;;  %s1695_s7 = inlined_call_operand.vmem [shape: f32[37,10], index: 7, kind: output, shape index: {}]  }
   0x1 LB: > { %s1119_s25 = sadd.s32 4294967295, %s1396_s24   ;;  %p1123_p0 = scmp.ge.s32.totalorder %s1396_s24, 1  ;;  %s1396_s24 = sphi %s1440_s24, %s17_s24  }
   0x2   : > { %p237_p1 = scmp.lt.s32.totalorder %s1396_s24, 6 }
   0x4   : > { %p238_p2 = pnand %p1123_p0, %p237_p1 }
   0x5   : > { %p268_p3 = scmp.lt.s32.totalorder (!%p238_p2), %s1119_s25, 4 }
   0x6   : > { %241 = sbr.rel (%p238_p2) target bundleno = 988 (0x3dc), region = 48 }
   0xb   : > { %v1325_v0 = vld [vmem:[%s1689_s1 + $0x78] sm:$0xff]   ;;  %v1329_v4 = vld [vmem:[%s1689_s1 + $0x70] sm:$0xff]   ;;  %v1333_v8 = vld [vmem:[%s1689_s1 + $0x68] sm:$0xff]   ;;  %s1697_s25 = smov (!%p268_p3, %s1119_s25), 4  ;;  %v1398_v44 = vmov 0.0   ;;  %vm1399_vm0 = vmmov 0  }
   0xc   : > { %v1326_v1 = vld [vmem:[%s1689_s1 + $0x38] sm:$0xff]   ;;  %1194 = vmatprep.subr.bf16.mxu0 %v1325_v0  ;;  %v1330_v5 = vld [vmem:[%s1689_s1 + $0x30] sm:$0xff]   ;;  %v1334_v9 = vld [vmem:[%s1689_s1 + $0x28] sm:$0xff]   ;;  %s1314_s11 = smul.u32 56, %s1697_s25  ;;  %vm691_vm1 = vcmask 130048   ;;  %vm1009_vm2 = vcmask 523264  }
   0xd   : > { %v1327_v2 = vld [vmem:[%s1689_s1 + $0xf8] sm:$0xff]   ;;  %1195 = vmatpush3.bf16.msra.mxu0 %v1326_v1  ;;  %v1331_v6 = vld [vmem:[%s1689_s1 + $0xf0] sm:$0xff]   ;;  %v1335_v10 = vld [vmem:[%s1689_s1 + $0xe8] sm:$0xff]   ;;  %vm1053_vm3 = vcmask 80896   ;;  %s1125_s10 = sshll.u32 %s1697_s25, 3 }
   0xe   : > { %v1328_v3 = vld [vmem:[%s1689_s1 + $0xb8] sm:$0xff]   ;;  %1216 = vmatprep.subr.bf16.mxu1 %v1327_v2  ;;  %1196 = vmatprep.subr.bf16.mxu0 %v1329_v4  ;;  %v1332_v7 = vld [vmem:[%s1689_s1 + $0xb0] sm:$0xff]   ;;  %v1336_v11 = vld [vmem:[%s1689_s1 + $0xa8] sm:$0xff]   ;;  %s1545_s22 = scalar_lea.vmem %s1688_s0, %s1314_s11  ;;  %s276_s13 = scalar_lea.vmem %s1695_s7, %s1125_s10 }
   0xf   : > { %1217 = vmatpush3.bf16.msra.mxu1 %v1328_v3  ;;  %v1337_v12 = vld [vmem:[%s1689_s1 + $0x60] sm:$0xff]   ;;  %v1341_v16 = vld [vmem:[%s1689_s1 + $0x58] sm:$0xff]   ;;  %v1345_v20 = vld [vmem:[%s1689_s1 + $0x50] sm:$0xff]  }
  0x10   : > { %1218 = vmatprep.subr.bf16.mxu1 %v1331_v6  ;;  %v1338_v13 = vld [vmem:[%s1689_s1 + $0x20] sm:$0xff]   ;;  %v1342_v17 = vld [vmem:[%s1689_s1 + $0x18] sm:$0xff]   ;;  %v1346_v21 = vld [vmem:[%s1689_s1 + $0x10] sm:$0xff]  }
  0x11   : > { %1197 = vmatpush3.bf16.msra.mxu0 %v1330_v5  ;;  %v1339_v14 = vld [vmem:[%s1689_s1 + $0xe0] sm:$0xff]   ;;  %v1343_v18 = vld [vmem:[%s1689_s1 + $0xd8] sm:$0xff]   ;;  %v1347_v22 = vld [vmem:[%s1689_s1 + $0xd0] sm:$0xff]  }
  0x12   : > { %1198 = vmatprep.subr.bf16.mxu0 %v1333_v8  ;;  %v1340_v15 = vld [vmem:[%s1689_s1 + $0xa0] sm:$0xff]   ;;  %v1344_v19 = vld [vmem:[%s1689_s1 + $0x98] sm:$0xff]   ;;  %v1348_v23 = vld [vmem:[%s1689_s1 + $0x90] sm:$0xff]  }
  0x13   : > { %1219 = vmatpush3.bf16.msra.mxu1 %v1332_v7  ;;  %v1349_v24 = vld [vmem:[%s1689_s1 + $0x48] sm:$0xff]   ;;  %v1353_v28 = vld [vmem:[%s1689_s1 + $0x40] sm:$0xff]   ;;  %v1357_v36 = vld [vmem:[%s1689_s1 + $0x178] sm:$0xff]  }
  0x14   : > { %1220 = vmatprep.subr.bf16.mxu1 %v1335_v10  ;;  %v1350_v25 = vld [vmem:[%s1689_s1 + $0x8] sm:$0xff]   ;;  %v1354_v29 = vld [vmem:[%s1689_s1] sm:$0xff]   ;;  %v281_v37 = vld [vmem:[%s1545_s22 + $0x18] sm:$0xff] }
  0x15   : > { %1199 = vmatpush3.bf16.msra.mxu0 %v1334_v9  ;;  %v1351_v26 = vld [vmem:[%s1689_s1 + $0xc8] sm:$0xff]   ;;  %v1355_v30 = vld [vmem:[%s1689_s1 + $0xc0] sm:$0xff]   ;;  %v288_v38 = vpack.c.bf16 %v281_v37, %v281_v37  ;;  %v1358_v39 = vld [vmem:[%s1689_s1 + $0x138] sm:$0xff]  }
  0x16   : > { %1200 = vmatprep.subr.bf16.mxu0 %v1337_v12  ;;  %v1352_v27 = vld [vmem:[%s1689_s1 + $0x88] sm:$0xff]   ;;  %v1356_v33 = vld [vmem:[%s1689_s1 + $0x80] sm:$0xff]   ;;  %v280_v40 = vld [vmem:[%s1545_s22 + $0x10] sm:$0xff] }
  0x17   : > { %1221 = vmatpush3.bf16.msra.mxu1 %v1336_v11  ;;  %v279_v31 = vld [vmem:[%s1545_s22 + $0x8] sm:$0xff]  ;;  %v278_v34 = vld [vmem:[%s1545_s22] sm:$0xff]  ;;  %767 = vmatprep.mubr.bf16.mxu1 %v288_v38  ;;  %v287_v41 = vpack.c.bf16 %v280_v40, %v280_v40  ;;  %v1359_v42 = vld [vmem:[%s1689_s1 + $0x170] sm:$0xff]  }
  0x18   : > { %1222 = vmatprep.subr.bf16.mxu1 %v1339_v14  ;;  %v286_v32 = vpack.c.bf16 %v279_v31, %v279_v31  ;;  %v285_v35 = vpack.c.bf16 %v278_v34, %v278_v34  ;;  %v1360_v43 = vld [vmem:[%s1689_s1 + $0x130] sm:$0xff]   ;;  %v1361_v45 = vld [vmem:[%s1689_s1 + $0x168] sm:$0xff]   ;;  %v1363_v47 = vld [vmem:[%s1689_s1 + $0x160] sm:$0xff]  }
  0x19   : > { %1201 = vmatpush3.bf16.msra.mxu0 %v1338_v13  ;;  %v1362_v46 = vld [vmem:[%s1689_s1 + $0x128] sm:$0xff]   ;;  %v1364_v48 = vld [vmem:[%s1689_s1 + $0x120] sm:$0xff]   ;;  %v1365_v49 = vld [vmem:[%s1689_s1 + $0x158] sm:$0xff]  }
  0x1a   : > { %1202 = vmatprep.subr.bf16.mxu0 %v1341_v16  ;;  %727 = vmatprep.mubr.bf16.mxu0 %v286_v32  ;;  %v1366_v50 = vld [vmem:[%s1689_s1 + $0x118] sm:$0xff]   ;;  %v1367_v51 = vld [vmem:[%s1689_s1 + $0x150] sm:$0xff]   ;;  %v1373_v53 = vld [vmem:[%s1689_s1 + $0x180] sm:$0xff]  }
  0x1b   : > { %1223 = vmatpush3.bf16.msra.mxu1 %v1340_v15  ;;  %v1368_v52 = vld [vmem:[%s1689_s1 + $0x110] sm:$0xff]   ;;  %v283_v54 = vld [vmem:[%s1545_s22 + $0x28] sm:$0xff]  ;;  %v1371_v60 = vld [vmem:[%s1689_s1 + $0x140] sm:$0xff]  }
  0x1c   : > { %1224 = vmatprep.subr.bf16.mxu1 %v1343_v18  ;;  %v1369_v55 = vld [vmem:[%s1689_s1 + $0x148] sm:$0xff]   ;;  %v290_v56 = vpack.c.bf16 %v283_v54, %v283_v54  ;;  %v284_v57 = vld [vmem:[%s1545_s22 + $0x30] sm:$0xff]  ;;  %v1372_v61 = vld [vmem:[%s1689_s1 + $0x100] sm:$0xff]  }
  0x1d   : > { %1203 = vmatpush3.bf16.msra.mxu0 %v1342_v17  ;;  %v291_v58 = vpack.c.bf16 %v284_v57, %v284_v57  ;;  %v1370_v59 = vld [vmem:[%s1689_s1 + $0x108] sm:$0xff]   ;;  %v282_v62 = vld [vmem:[%s1545_s22 + $0x20] sm:$0xff]  ;;  %v1374_v0 = vld [vmem:[%s1691_s3 + $0x38] sm:$0xff]  }
  0x1e   : > { %1204 = vmatprep.subr.bf16.mxu0 %v1345_v20  ;;  %v289_v63 = vpack.c.bf16 %v282_v62, %v282_v62  ;;  %v1375_v1 = vld [vmem:[%s1691_s3 + $0x30] sm:$0xff]   ;;  %v1376_v2 = vld [vmem:[%s1691_s3 + $0x28] sm:$0xff]   ;;  %v1377_v3 = vld [vmem:[%s1691_s3 + $0x20] sm:$0xff]  }
  0x1f   : > { %1225 = vmatpush3.bf16.msra.mxu1 %v1344_v19  ;;  %v1378_v4 = vld [vmem:[%s1691_s3 + $0x18] sm:$0xff]   ;;  %v1379_v5 = vld [vmem:[%s1691_s3 + $0x10] sm:$0xff]   ;;  %v1380_v6 = vld [vmem:[%s1691_s3 + $0x8] sm:$0xff]  }
  0x20   : > { %1226 = vmatprep.subr.bf16.mxu1 %v1347_v22  ;;  %v1381_v7 = vld [vmem:[%s1691_s3] sm:$0xff]   ;;  %v1382_v8 = vld [vmem:[%s1693_s5 + $0x18] sm:$0xff]   ;;  %v1383_v9 = vld [vmem:[%s1693_s5 + $0x10] sm:$0xff]  }
  0x21   : > { %1205 = vmatpush3.bf16.msra.mxu0 %v1346_v21  ;;  %v1385_v37 = vld [vmem:[%s1693_s5] sm:$0xff]  }
  0x22   : > { %1206 = vmatprep.subr.bf16.mxu0 %v1349_v24  ;;  %v1177_v38 = vld [vmem:[%s1692_s4] ss:$0 sm:$0xff] }
  0x23   : > { %1227 = vmatpush3.bf16.msra.mxu1 %v1348_v23  ;;  %v1126_v23 = vld [vmem:[%s1690_s2] ss:$0 sm:$0xff] }
  0x24   : > { %1228 = vmatprep.subr.bf16.mxu1 %v1351_v26 }
  0x25   : > { %1207 = vmatpush3.bf16.msra.mxu0 %v1350_v25 }
  0x26   : > { %1208 = vmatprep.subr.bf16.mxu0 %v1353_v28 }
  0x27   : > { %1229 = vmatpush3.bf16.msra.mxu1 %v1352_v27 }
  0x28   : > { %1230 = vmatprep.subr.bf16.mxu1 %v1355_v30 }
  0x29   : > { %1209 = vmatpush3.bf16.msra.mxu0 %v1354_v29 }
  0x2a   : > { %1238 = vmatprep.subr.bf16.mxu0 %v1357_v36  ;;  %v1384_v36 = vld [vmem:[%s1693_s5 + $0x8] sm:$0xff]  }
  0x2b   : > { %1231 = vmatpush3.bf16.msra.mxu1 %v1356_v33 }
  0x2c   : > { %728 = vmatmul.mubr.bf16.vlgmr.msra.gmra.mxu0 %v285_v35  ;;  %1276 = vmatprep.subr.bf16.mxu1 %v1398_v44 }
  0x2d   : > { %1239 = vmatpush3.bf16.msra.mxu0 %v1358_v39  ;;  %807 = vmatprep.mubr.bf16.mxu0 %v290_v56 }
  0x2e   : > { %768 = vmatmul.mubr.bf16.vlgmr.msra.gmra.mxu1 %v287_v41  ;;  %1240 = vmatprep.subr.bf16.mxu0 %v1359_v42 }
  0x2f   : > { %1278 = vmatprep.mubr.msk.bf16.mxu1 %vm1399_vm0, %v1398_v44  ;;  %1277 = vmatpush3.bf16.msra.mxu1 %v1373_v53 }
  0x30   : > { %1282 = vmatprep.subr.bf16.mxu1 %v1398_v44 }
  0x31   : > { %1241 = vmatpush3.bf16.msra.mxu0 %v1360_v43 }
  0x32   : > { %1242 = vmatprep.subr.bf16.mxu0 %v1361_v45 }
  0x35   : > { %1243 = vmatpush3.bf16.msra.mxu0 %v1362_v46 }
  0x36   : > { %1244 = vmatprep.subr.bf16.mxu0 %v1363_v47  ;;  %1279 = vmatmul.mubr.msk.bf16.vlgmr.msra.gmra.mxu1 %vm691_vm1, %v291_v58 }
  0x37   : > { %1298 = vmatprep.mubr.msk.bf16.mxu1 %vm1399_vm0, %v1398_v44  ;;  %1283 = vmatpush3.bf16.msra.mxu1 %v1374_v0 }
  0x38   : > { %1284 = vmatprep.subr.bf16.mxu1 %v1398_v44 }
  0x39   : > { %1245 = vmatpush3.bf16.msra.mxu0 %v1364_v48 }
  0x3a   : > { %1246 = vmatprep.subr.bf16.mxu0 %v1365_v49 }
  0x3b   : > { %1285 = vmatpush3.bf16.msra.mxu1 %v1375_v1 }
  0x3c   : > { %1286 = vmatprep.subr.bf16.mxu1 %v1398_v44 }
  0x3d   : > { %1247 = vmatpush3.bf16.msra.mxu0 %v1366_v50 }
  0x3e   : > { %1248 = vmatprep.subr.bf16.mxu0 %v1367_v51 }
  0x3f   : > { %1287 = vmatpush3.bf16.msra.mxu1 %v1376_v2 }
  0x40   : > { %1288 = vmatprep.subr.bf16.mxu1 %v1398_v44 }
  0x41   : > { %1249 = vmatpush3.bf16.msra.mxu0 %v1368_v52 }
  0x42   : > { %1250 = vmatprep.subr.bf16.mxu0 %v1369_v55 }
  0x43   : > { %1289 = vmatpush3.bf16.msra.mxu1 %v1377_v3 }
  0x44   : > { %1290 = vmatprep.subr.bf16.mxu1 %v1398_v44 }
  0x45   : > { %1251 = vmatpush3.bf16.msra.mxu0 %v1370_v59 }
  0x46   : > { %1252 = vmatprep.subr.bf16.mxu0 %v1371_v60 }
  0x47   : > { %1291 = vmatpush3.bf16.msra.mxu1 %v1378_v4 }
  0x48   : > { %1292 = vmatprep.subr.bf16.mxu1 %v1398_v44 }
  0x49   : > { %1253 = vmatpush3.bf16.msra.mxu0 %v1372_v61 }
  0x4a   : > { %1302 = vmatprep.subr.bf16.mxu0 %v1398_v44 }
  0x4b   : > { %1293 = vmatpush3.bf16.msra.mxu1 %v1379_v5 }
  0x4c   : > { %808 = vmatmul.mubr.bf16.vlgmr.msra.gmra.mxu0 %v289_v63  ;;  %1294 = vmatprep.subr.bf16.mxu1 %v1398_v44 }
  0x4d   : > { %1310 = vmatprep.mubr.msk.bf16.mxu0 %vm1399_vm0, %v1398_v44  ;;  %1303 = vmatpush3.bf16.msra.mxu0 %v1382_v8 }
  0x4e   : > { %1304 = vmatprep.subr.bf16.mxu0 %v1398_v44 }
  0x4f   : > { %1295 = vmatpush3.bf16.msra.mxu1 %v1380_v6 }
  0x50   : > { %1296 = vmatprep.subr.bf16.mxu1 %v1398_v44 }
  0x51   : > { %1305 = vmatpush3.bf16.msra.mxu0 %v1383_v9 }
  0x52   : > { %1306 = vmatprep.subr.bf16.mxu0 %v1398_v44 }
  0x53   : > { %1297 = vmatpush3.bf16.msra.mxu1 %v1381_v7 }
  0x55   : > { %1307 = vmatpush3.bf16.msra.mxu0 %v1384_v36 }
  0x56   : > { %1308 = vmatprep.subr.bf16.mxu0 %v1398_v44  ;;  %v1186_v44 = vld [vmem:[%s1694_s6] ss:$0 sm:$0xff] }
  0x59   : > { %1309 = vmatpush3.bf16.msra.mxu0 %v1385_v37 }
  0xec   : > { %v1210_v10 = vpop.f32.mrf.mxu0 }
  0xee   : > { %v1211_v11 = vpop.f32.mrf.mxu0  ;;  %v1232_v12 = vpop.f32.mrf.mxu1 }
  0xef   : > { %v1212_v22 = vadd.f32 %v1211_v11, %v1210_v10 }
  0xf0   : > { %v1213_v13 = vpop.f32.mrf.mxu0  ;;  %v1233_v14 = vpop.f32.mrf.mxu1 }
  0xf1   : > { %v730_v24 = vadd.f32 %v1212_v22, %v1126_v23  ;;  %v1234_v25 = vadd.f32 %v1233_v14, %v1232_v12 }
  0xf2   : > { %v1214_v15 = vpop.f32.mrf.mxu0  ;;  %v1235_v16 = vpop.f32.mrf.mxu1 }
  0xf3   : > { %v770_v28 = vadd.f32 %v1234_v25, %v730_v24 }
  0xf4   : > { %v1236_v17 = vpop.f32.mrf.mxu1 }
  0xf6   : > { %v849_v18 = vpop.f32.mrf.mxu1 }
  0xf8   : > { %v1280_v19 = vpop.f32.mrf.mxu1 }
  0xfa   : > { %v852_v20 = vpop.f32.mrf.mxu1 }
  0xfc   : > { %v1281_v21 = vpop.f32.mrf.mxu1 }
 0x10c   : > { %v1254_v26 = vpop.f32.mrf.mxu0 }
 0x10e   : > { %v1255_v27 = vpop.f32.mrf.mxu0 }
 0x10f   : > { %v1256_v29 = vadd.f32 %v1255_v27, %v1254_v26 }
 0x110   : > { %v1257_v30 = vpop.f32.mrf.mxu0 }
 0x111   : > { %v810_v31 = vadd.f32 %v1256_v29, %v770_v28 }
 0x112   : > { %v1258_v32 = vpop.f32.mrf.mxu0 }
 0x113   : > { %v850_v33 = vadd.f32 %v849_v18, %v810_v31 }
 0x115   : > { %v855_v34 = vmax.f32 %v850_v33, 0.0 }
 0x117   : > { %v856_v35 = vpack.c.bf16 %v855_v34, %v855_v34 }
 0x119   : > { %1299 = vmatmul.mubr.bf16.vlgmr.msra.gmra.mxu1 %v856_v35 }
 0x1d9   : > { %v962_v39 = vpop.f32.mrf.mxu1 }
 0x1da   : > { %v963_v40 = vadd.f32 %v1177_v38, %v962_v39 }
 0x1db   : > { %v1300_v41 = vpop.f32.mrf.mxu1 }
 0x1dc   : > { %v968_v42 = vmax.f32 %v963_v40, 0.0 }
 0x1dd   : > { %v965_v43 = vpop.f32.mrf.mxu1 }
 0x1de   : > { %v969_v45 = vpack.c.bf16 %v968_v42, %v968_v42 }
 0x1df   : > { %v1301_v46 = vpop.f32.mrf.mxu1 }
 0x1e0   : > { %1311 = vmatmul.mubr.msk.bf16.vlgmr.msra.gmra.mxu0 %vm1009_vm2, %v969_v45 }
 0x2a0   : > { %v1047_v47 = vpop.f32.mrf.mxu0 }
 0x2a1   : > { %v1048_v48 = vadd.f32 %v1186_v44, %v1047_v47 }
 0x2a2   : > { %v1312_v49 = vpop.f32.mrf.mxu0 }
 0x2a3   : > { %v1054_v50 = vsel %vm1053_vm3, %v1048_v48, -inf }
 0x2a4   : > { %1055 = vmax.xlane.f32.xlu0 %v1054_v50  ;;  %v1050_v51 = vpop.f32.mrf.mxu0 }
 0x2a6   : > { %v1313_v52 = vpop.f32.mrf.mxu0 }
 0x32d   : > { %v1056_v53 = vpop.xlane.xlu0 %1055 }
 0x32e   : > { %v1057_v54 = vsub.f32 %v1048_v48, %v1056_v53 }
 0x330   : > { %v1058_v55 = vmul.f32 1.442695, %v1057_v54 }
 0x332   : > { %1386 = vpow2.f32 %v1058_v55 }
 0x33f   : > { %v1387_v56 = vpop.eup %1386 }
 0x340   : > { %v1060_v57 = vsel %vm1053_vm3, %v1387_v56, 0.0 }
 0x341   : > { %1061 = vadd.xlane.f32.xlu0 %v1060_v57 }
 0x3ca   : > { %v1062_v58 = vpop.xlane.xlu0 %1061 }
 0x3cb   : > { %1388 = vrcp.f32 %v1062_v58 }
 0x3d8   : > { %v1389_v59 = vpop.eup %1388 }
 0x3d9   : > { %v1064_v60 = vmul.f32 %v1389_v59, %v1387_v56 }
 0x3db   : > { %1065 = vst.msk [vmem:[%s276_s13] sm:$0xff] %vm1053_vm3, %v1064_v60 }
 0x3dc PF: > { %s17_s24 = sadd.s32 1, %s1396_s24  }
 0x3dd   : > { %p14_p4 = scmp.ge.s32.totalorder %s17_s24, 7  }
 0x3df   :  { %16 = sbr.rel (!%p14_p4) target bundleno = 1 (0x1), region = 78 }

</bundles_post_ra>
